<compile_context>
chip_gen: v5e
topology: v5e:2x2
jax: 0.10.0
libtpu: 0.0.40
codegen_flags: <defaults>
</compile_context>

<pallas_src>
import functools

import jax
import jax.numpy as jnp
import numpy as np
from jax.experimental import pallas as pl
from jax.experimental.pallas import tpu as pltpu

_LANE = 128
_FUSED_MAX_PIXELS = 1024                 # <= 32x32 -> fused Kronecker path
_TM_CAP = 1024                           # max rows per grid step
_VMEM_TILE_BUDGET = 36 * 1024 * 1024     # tiling budget, under v7x 64 MiB physical


def _round_up(v, m):
    return -(-v // m) * m


# -----------------------------------------------------------------------------
# Pallas kernel: compensated-bf16 matmul  (TM, K) @ (K, Npad) -> (TM, Npad)
# -----------------------------------------------------------------------------
def _mm_kernel(x_ref, a_hi_ref, a_lo_ref, o_ref):
    x = x_ref[...]                                        # (TM, K) f32
    x_hi = x.astype(jnp.bfloat16)
    x_lo = (x - x_hi.astype(jnp.float32)).astype(jnp.bfloat16)
    a_hi = a_hi_ref[...]                                  # (K, Npad) bf16
    a_lo = a_lo_ref[...]
    acc = jnp.dot(x_hi, a_hi, preferred_element_type=jnp.float32)
    acc += jnp.dot(x_lo, a_hi, preferred_element_type=jnp.float32)
    acc += jnp.dot(x_hi, a_lo, preferred_element_type=jnp.float32)
    o_ref[...] = acc.astype(o_ref.dtype)


def _choose_tile_m(m, k, n_pad):
    """Adaptive row tile: as large as the VMEM budget allows, divisor of m if possible."""
    per_row = 2 * k * 4 + k * 4 + 2 * n_pad * 4      # x (2 bufs) + hi/lo copies + out (2 bufs)
    op_bytes = 2 * 2 * k * n_pad * 2                 # a_hi + a_lo bf16, double-buffered
    avail = max(_VMEM_TILE_BUDGET - op_bytes, 2 * 1024 * 1024)
    cap = max(8, min(_TM_CAP, (avail // per_row) // 8 * 8))
    if m <= cap:
        return m, 1                                  # one full-size block, no row padding
    n_blocks = -(-m // cap)
    tm = _round_up(-(-m // n_blocks), 8)
    for cand in range(tm, min(cap, tm + 256) + 1, 8):
        if m % cand == 0:
            return cand, m // cand                   # exact divisor: no padding / no slice
    return tm, -(-m // tm)                           # fallback: minimal row padding


def _pallas_matmul(x, a_np):
    """x: (M, K) f32 device array; a_np: (K, N) host float array.  Returns (M, N) f32."""
    m, k = x.shape
    n = a_np.shape[1]
    n_pad = _round_up(n, _LANE)                      # lane-dense output columns
    if n_pad != n:
        a_np = np.pad(a_np, ((0, 0), (0, n_pad - n)))

    a_f32 = jnp.asarray(a_np, dtype=jnp.float32)
    a_hi = a_f32.astype(jnp.bfloat16)
    a_lo = (a_f32 - a_hi.astype(jnp.float32)).astype(jnp.bfloat16)

    tm, n_blocks = _choose_tile_m(m, k, n_pad)
    m_pad = tm * n_blocks
    x_in = x if m_pad == m else jnp.pad(x, ((0, m_pad - m), (0, 0)))

    footprint = (2 * tm * k * 4 + tm * k * 4         # x block (2 bufs) + in-kernel hi/lo
                 + 2 * 2 * k * n_pad * 2             # operator hi+lo bf16 (2 bufs each)
                 + 2 * tm * n_pad * 4)               # out block (2 bufs)
    vmem_limit = int(min(max(footprint * 5 // 4, 32 * 1024 * 1024), 56 * 1024 * 1024))

    cost = pl.CostEstimate(
        flops=6 * m_pad * k * n_pad,                 # 3 bf16 MXU passes
        transcendentals=0,
        bytes_accessed=m_pad * k * 4 + 2 * k * n_pad * 2 + m_pad * n_pad * 4)

    out = pl.pallas_call(
        _mm_kernel,
        out_shape=jax.ShapeDtypeStruct((m_pad, n_pad), jnp.float32),
        grid=(n_blocks,),
        in_specs=[
            pl.BlockSpec((tm, k), lambda i: (i, 0)),
            pl.BlockSpec((k, n_pad), lambda i: (0, 0)),
            pl.BlockSpec((k, n_pad), lambda i: (0, 0)),
        ],
        out_specs=pl.BlockSpec((tm, n_pad), lambda i: (i, 0)),
        compiler_params=pltpu.CompilerParams(
            dimension_semantics=("parallel",),
            vmem_limit_bytes=vmem_limit),
        cost_estimate=cost,
    )(x_in, a_hi, a_lo)

    if m_pad != m:
        out = out[:m]
    if n_pad != n:
        out = out[:, :n]
    return out


# -----------------------------------------------------------------------------
# Host (NumPy, float64) construction of the per-axis operators — data independent
# -----------------------------------------------------------------------------
def _forward_op_np(n):
    """zero-pad -> fft(norm='forward') -> fftshift -> spectral crop, as a (Nc, n) matrix."""
    pad_lo = n // 2 - 1
    n_pad = n + (n // 2 - 1) + (n // 2)
    k = np.arange(n_pad)
    d = np.exp(-2j * np.pi * np.outer(k, k) / n_pad) / n_pad     # forward norm: 1/N
    d = np.roll(d, n_pad // 2, axis=0)                           # fftshift on the output index
    lo, hi = int(n_pad / 4), int(n_pad / 4 * 3)
    d = d[lo:hi, pad_lo:pad_lo + n]                              # crop + fold zero padding
    return d, n_pad, lo, hi


def _inverse_op_np(n_crop):
    """ifftshift -> unnormalized ifft (norm='forward') -> spatial crop, as a matrix."""
    k = np.arange(n_crop)
    g = np.exp(2j * np.pi * np.outer(k, k) / n_crop)             # no scaling
    lo, hi = int(n_crop / 4), int(3 * n_crop / 4)
    g = g[lo:hi, :]
    # fold ifftshift of the input:  ifftshift(v)[j] = v[(j + n//2) % n]
    g = np.roll(g, n_crop // 2, axis=1)
    return g


@functools.lru_cache(maxsize=None)
def _build_axis_ops(h, w):
    """Complex per-axis operators M_H (Ho, H), M_W (W, Wo) of the full forward pass."""
    f_h, hp, h_lo, h_hi = _forward_op_np(h)
    f_w, wp, w_lo, w_hi = _forward_op_np(w)
    g_h = _inverse_op_np(f_h.shape[0])
    g_w = _inverse_op_np(f_w.shape[0])
    # window separability: sqrt(outer(a, b)) == outer(sqrt(a), sqrt(b))   (hamming >= 0)
    sh = np.sqrt(np.abs(np.hamming(hp)))[h_lo:h_hi]
    sw = np.sqrt(np.abs(np.hamming(wp)))[w_lo:w_hi]
    m_h = g_h @ (sh[:, None] * f_h)            # (Ho, H) complex
    m_w = (g_w @ (sw[:, None] * f_w)).T        # (W, Wo) complex
    return m_h, m_w


@functools.lru_cache(maxsize=None)
def _build_kron_operator(h, w):
    m_h, m_w = _build_axis_ops(h, w)
    ho, wo = m_h.shape[0], m_w.shape[1]
    # out[p, q] = Re( sum_{i,j} M_H[p,i] x[i,j] M_W[j,q] )  ->  x_flat @ A
    a = np.real(np.einsum('pi,jq->ijpq', m_h, m_w)).reshape(h * w, ho * wo)
    return np.ascontiguousarray(a), ho, wo


@functools.lru_cache(maxsize=None)
def _build_separable_operators(h, w):
    m_h, m_w = _build_axis_ops(h, w)
    ho, wo = m_h.shape[0], m_w.shape[1]
    cw = np.ascontiguousarray(np.concatenate([m_w.real, m_w.imag], axis=1))       # (W, 2*Wo)
    ch = np.ascontiguousarray(np.concatenate([m_h.real.T, -m_h.imag.T], axis=0))  # (2*H, Ho)
    return cw, ch, ho, wo


# -----------------------------------------------------------------------------
# Wrapper
# -----------------------------------------------------------------------------
def asap_padding_large(x):
    b, c, h, w = x.shape
    bc = b * c
    x = x.astype(jnp.float32)

    if h * w <= _FUSED_MAX_PIXELS:
        # Small images: single fused matmul against the Kronecker-folded operator.
        a_np, ho, wo = _build_kron_operator(h, w)
        out = _pallas_matmul(x.reshape(bc, h * w), a_np)          # (BC, Ho*Wo)
        return out.reshape(b, c, ho, wo)

    # Large images: two-stage separable form (operator memory O(W*Wo + H*Ho)).
    cw, ch, ho, wo = _build_separable_operators(h, w)
    # stage 1: contract W             (BC*H, W) @ (W, 2*Wo) -> [X Re(M_W) | X Im(M_W)]
    t = _pallas_matmul(x.reshape(bc * h, w), cw)                  # (BC*H, 2*Wo)
    # re-layout so the H contraction is the lane-contiguous K dim (one XLA transpose pass)
    lhs2 = jnp.transpose(t.reshape(bc, h, 2, wo), (0, 3, 2, 1)).reshape(bc * wo, 2 * h)
    # stage 2: contract H             (BC*Wo, 2H) @ [Re(M_H)^T ; -Im(M_H)^T]
    o2 = _pallas_matmul(lhs2, ch)                                 # (BC*Wo, Ho)
    out = jnp.transpose(o2.reshape(bc, wo, ho), (0, 2, 1))        # (BC, Ho, Wo)
    return out.reshape(b, c, ho, wo)


# -----------------------------------------------------------------------------
# NumPy reference (exact mirror of the PyTorch forward, float64)
# -----------------------------------------------------------------------------
def reference_np(x):
    x = np.asarray(x, dtype=np.float64)
    _, _, h, w = x.shape
    xp = np.pad(x, ((0, 0), (0, 0), (h // 2 - 1, h // 2), (w // 2 - 1, w // 2)))
    hp, wp = xp.shape[2], xp.shape[3]
    w2d = np.sqrt(np.outer(np.abs(np.hamming(hp)), np.abs(np.hamming(wp))))
    low = np.fft.fftshift(np.fft.fft2(xp, norm="forward"))        # all axes, like torch default
    low = low * w2d[None, None]
    low = low[:, :, int(hp / 4):int(hp / 4 * 3), int(wp / 4):int(wp / 4 * 3)]
    fc = np.fft.ifft2(np.fft.ifftshift(low), norm="forward").real
    h2, w2_ = fc.shape[2], fc.shape[3]
    return fc[:, :, int(h2 / 4):int(3 * h2 / 4), int(w2_ / 4):int(3 * w2_ / 4)]


if __name__ == "__main__":
    key = jax.random.PRNGKey(0)

    # Small-image path (fused Kronecker operator), the shape implied by the module.
    x_small = jax.random.normal(key, (2, 4, 16, 16), dtype=jnp.float32)
    out_small = jax.block_until_ready(asap_padding_large(x_small))
    assert out_small.shape == (2, 4, 8, 8), out_small.shape
    err_small = float(np.max(np.abs(np.asarray(out_small) - reference_np(np.asarray(x_small)))))
    assert err_small < 5e-3, f"fused-path max abs error {err_small}"

    # Large-image path (two-stage separable operators), still a small test shape.
    x_large = jax.random.normal(jax.random.PRNGKey(0), (1, 2, 48, 48), dtype=jnp.float32)
    out_large = jax.block_until_ready(asap_padding_large(x_large))
    assert out_large.shape == (1, 2, 24, 24), out_large.shape
    err_large = float(np.max(np.abs(np.asarray(out_large) - reference_np(np.asarray(x_large)))))
    assert err_large < 1e-2, f"separable-path max abs error {err_large}"

    print("KERNEL_OK")
</pallas_src>

<mosaic_0001>
module attributes {stable_mosaic.version = 11 : i64} {
  func.func @_mm_kernel(%arg0: i32, %arg1: memref<8x256xf32, #tpu.memory_space<vmem>>, %arg2: memref<256x128xbf16, #tpu.memory_space<vmem>>, %arg3: memref<256x128xbf16, #tpu.memory_space<vmem>>, %arg4: memref<8x128xf32, #tpu.memory_space<vmem>>) attributes {dimension_semantics = [#tpu.dimension_semantics<parallel>], iteration_bounds = array<i64: 1>, scalar_prefetch = 0 : i64, scratch_operands = 0 : i64, tpu.core_type = #tpu.core_type<tc>, window_params = [{transform_indices = @transform_0, window_bounds = array<i64: 8, 256>}, {pipeline_mode = #tpu.pipeline_mode<synchronous>, transform_indices = @transform_1, window_bounds = array<i64: 256, 128>}, {pipeline_mode = #tpu.pipeline_mode<synchronous>, transform_indices = @transform_2, window_bounds = array<i64: 256, 128>}, {transform_indices = @transform_3, window_bounds = array<i64: 8, 128>}]} {
    %c0 = arith.constant 0 : index
    %c0_0 = arith.constant 0 : index
    %0 = vector.load %arg1[%c0, %c0_0] : memref<8x256xf32, #tpu.memory_space<vmem>>, vector<8x256xf32>
    %1 = arith.truncf %0 : vector<8x256xf32> to vector<8x256xbf16>
    %2 = arith.extf %1 : vector<8x256xbf16> to vector<8x256xf32>
    %3 = arith.subf %0, %2 : vector<8x256xf32>
    %4 = arith.truncf %3 : vector<8x256xf32> to vector<8x256xbf16>
    %c0_1 = arith.constant 0 : index
    %c0_2 = arith.constant 0 : index
    %5 = vector.load %arg2[%c0_1, %c0_2] : memref<256x128xbf16, #tpu.memory_space<vmem>>, vector<256x128xbf16>
    %c0_3 = arith.constant 0 : index
    %c0_4 = arith.constant 0 : index
    %6 = vector.load %arg3[%c0_3, %c0_4] : memref<256x128xbf16, #tpu.memory_space<vmem>>, vector<256x128xbf16>
    %cst = arith.constant dense<0.000000e+00> : vector<8x128xf32>
    %7 = tpu.matmul %1, %5, %cst {dimension_numbers = #tpu.dot_dimension_numbers<[1], [0], [0], [1], [0, 0, 1, 1], [], []>} : vector<8x256xbf16>, vector<256x128xbf16>, vector<8x128xf32> -> vector<8x128xf32>
    %cst_5 = arith.constant dense<0.000000e+00> : vector<8x128xf32>
    %8 = tpu.matmul %4, %5, %cst_5 {dimension_numbers = #tpu.dot_dimension_numbers<[1], [0], [0], [1], [0, 0, 1, 1], [], []>} : vector<8x256xbf16>, vector<256x128xbf16>, vector<8x128xf32> -> vector<8x128xf32>
    %9 = arith.addf %7, %8 : vector<8x128xf32>
    %cst_6 = arith.constant dense<0.000000e+00> : vector<8x128xf32>
    %10 = tpu.matmul %1, %6, %cst_6 {dimension_numbers = #tpu.dot_dimension_numbers<[1], [0], [0], [1], [0, 0, 1, 1], [], []>} : vector<8x256xbf16>, vector<256x128xbf16>, vector<8x128xf32> -> vector<8x128xf32>
    %11 = arith.addf %9, %10 : vector<8x128xf32>
    %c0_7 = arith.constant 0 : index
    %c0_8 = arith.constant 0 : index
    %12 = vector.load %arg4[%c0_7, %c0_8] : memref<8x128xf32, #tpu.memory_space<vmem>>, vector<8x128xf32>
    tpu.vector_store %arg4[%c0_7, %c0_8], %11 {strides = array<i32>} : memref<8x128xf32, #tpu.memory_space<vmem>>, vector<8x128xf32>,
    return
  }
  func.func @transform_0(%arg0: i32) -> (i32, i32) {
    %c0_i32 = arith.constant 0 : i32
    %c0_i32_0 = arith.constant 0 : i32
    return %arg0, %c0_i32 : i32, i32
  }
  func.func @transform_1(%arg0: i32) -> (i32, i32) {
    %c0_i32 = arith.constant 0 : i32
    %c0_i32_0 = arith.constant 0 : i32
    %c0_i32_1 = arith.constant 0 : i32
    return %c0_i32, %c0_i32_0 : i32, i32
  }
  func.func @transform_2(%arg0: i32) -> (i32, i32) {
    %c0_i32 = arith.constant 0 : i32
    %c0_i32_0 = arith.constant 0 : i32
    %c0_i32_1 = arith.constant 0 : i32
    return %c0_i32, %c0_i32_0 : i32, i32
  }
  func.func @transform_3(%arg0: i32) -> (i32, i32) {
    %c0_i32 = arith.constant 0 : i32
    %c0_i32_0 = arith.constant 0 : i32
    return %arg0, %c0_i32 : i32, i32
  }
}

</mosaic_0001>

<bundles_post_ra>
// kernel: tpu_custom_call.1
= control target key start
LH: loop header
LB: loop body
LE: loop exit
PB: predicated region body
PF: predicated region fallthrough
CT: control target
= control target key end

     0   :  { %8 = vsyncpa [#allocation3], 0  ;;  %s736_s0 = inlined_call_operand.hbm [shape: f32[8,256], index: 0, kind: input, shape index: {}]   ;;  %s737_s1 = inlined_call_operand.hbm [shape: bf16[256,128], index: 1, kind: input, shape index: {}]   ;;  %s738_s2 = inlined_call_operand.hbm [shape: bf16[256,128], index: 2, kind: input, shape index: {}]   ;;  %s739_s3 = inlined_call_operand.hbm [shape: f32[8,128], index: 3, kind: output, shape index: {}]  }
   0x1   :  { %9 = vsyncpa [#allocation6], 0  ;;  %s26_s14 = sshll.u32 %s737_s1, 4  ;;  %s27_s14 = int_to_ptr.hbm [resolvable:$true] %s26_s14 }
   0x2   :  { %10 = vsyncpa [#allocation4], 0  ;;  %s698_s15 = smov [#allocation5]   ;;  %s16_s19 = sshll.u32 %s736_s0, 4  ;;  %s17_s19 = int_to_ptr.hbm [resolvable:$true] %s16_s19 }
   0x3   :  { %s28_s16 = sshll.u32 %s698_s15, 4  ;;  %s699_s20 = smov 64   ;;  %s29_s16 = int_to_ptr.vmem [resolvable:$true] %s28_s16 }
   0x4   :  { %s700_s21 = smov 4   ;;  %s701_s22 = smov [#allocation2]  }
   0x5   :  { %34 = dma.hbm_to_vmem [thread:$0]  %s27_s14, 2048, %s29_s16, [#allocation6], %s699_s20, %s699_s20, %s700_s21  }
   0x6   :  { %s18_s23 = sshll.u32 %s701_s22, 4  ;;  %s39_s26 = sshll.u32 %s738_s2, 4  ;;  %s19_s23 = int_to_ptr.vmem [resolvable:$true] %s18_s23  ;;  %s40_s26 = int_to_ptr.hbm [resolvable:$true] %s39_s26 }
   0x7   :  { %21 = dma.hbm_to_vmem [thread:$0]  %s17_s19, 256, %s19_s23, [#allocation3]  }
   0x8   :  { %s702_s1 = smov [#allocation7]  }
   0x9   :  { %s41_s27 = sshll.u32 %s702_s1, 4  ;;  %s42_s27 = int_to_ptr.vmem [resolvable:$true] %s41_s27 }
   0xa   :  { %47 = dma.hbm_to_vmem [thread:$0]  %s40_s26, 2048, %s42_s27, [#allocation6], %s699_s20, %s699_s20, %s700_s21  }
   0xb   :  { %692 = dma.done.wait [#allocation3], 256  }
   0xc   :  { %693 = vsyncadd [#allocation3], 4294967040 }
   0xd   :  { %694 = dma.done.wait [#allocation6], 4096  }
   0xe   :  { %695 = vsyncadd [#allocation6], 4294963200  ;;  %v565_v0 = vld [vmem:[#allocation5 + $0x38] sm:$0xff]  ;;  %v564_v2 = vld [vmem:[#allocation5 + $0x30] sm:$0xff]  ;;  %s703_s0 = smov [#allocation8]   ;;  %s419_s30 = sshll.u32 %s739_s3, 4  ;;  %s420_s30 = int_to_ptr.hbm [resolvable:$true] %s419_s30 }
   0xf   :  { %v573_v1 = vld [vmem:[#allocation5 + $0x78] sm:$0xff]  ;;  %229 = vmatpush.bf16.msra.mxu0 %v565_v0  ;;  %v572_v3 = vld [vmem:[#allocation5 + $0x70] sm:$0xff]  ;;  %262 = vmatpush.bf16.msra.mxu2 %v565_v0  ;;  %v563_v4 = vld [vmem:[#allocation5 + $0x28] sm:$0xff]  ;;  %s417_s2 = sshll.u32 %s703_s0, 4  ;;  %s418_s2 = int_to_ptr.vmem [resolvable:$true] %s417_s2 }
  0x10   :  { %242 = vmatpush.bf16.msra.mxu1 %v573_v1  ;;  %275 = vmatpush.bf16.msra.mxu3 %v573_v1  ;;  %v571_v5 = vld [vmem:[#allocation5 + $0x68] sm:$0xff]  ;;  %v562_v6 = vld [vmem:[#allocation5 + $0x20] sm:$0xff]  ;;  %v561_v8 = vld [vmem:[#allocation5 + $0x18] sm:$0xff] }
  0x11   :  { %v570_v7 = vld [vmem:[#allocation5 + $0x60] sm:$0xff]  ;;  %v569_v9 = vld [vmem:[#allocation5 + $0x58] sm:$0xff]  ;;  %v60_v10 = vld [vmem:[#allocation2] sm:$0xff] }
  0x12   :  { %v61_v11 = vld [vmem:[#allocation2 + $0x8] sm:$0xff]  ;;  %v560_v13 = vld [vmem:[#allocation5 + $0x10] sm:$0xff]  ;;  %v559_v17 = vld [vmem:[#allocation5 + $0x8] sm:$0xff] }
  0x13   :  { %230 = vmatpush.bf16.msra.mxu0 %v564_v2  ;;  %263 = vmatpush.bf16.msra.mxu2 %v564_v2  ;;  %v62_v12 = vpack.c.bf16 %v61_v11, %v60_v10  ;;  %v568_v14 = vld [vmem:[#allocation5 + $0x50] sm:$0xff]  ;;  %v567_v18 = vld [vmem:[#allocation5 + $0x48] sm:$0xff]  ;;  %v558_v21 = vld [vmem:[#allocation5] sm:$0xff] }
  0x14   :  { %243 = vmatpush.bf16.msra.mxu1 %v572_v3  ;;  %276 = vmatpush.bf16.msra.mxu3 %v572_v3  ;;  %v566_v22 = vld [vmem:[#allocation5 + $0x40] sm:$0xff]  ;;  %v581_v23 = vld [vmem:[#allocation7 + $0x38] sm:$0xff]  ;;  %v580_v29 = vld [vmem:[#allocation7 + $0x30] sm:$0xff] }
  0x15   :  { %v63_v15 = vunpack.c.l.bf16 %v62_v12  ;;  %v64_v16 = vunpack.c.h.bf16 %v62_v12  ;;  %v589_v24 = vld [vmem:[#allocation7 + $0x78] sm:$0xff]  ;;  %v256_v25 = vunpack.c.l.b16 %v62_v12  ;;  %v257_v26 = vunpack.c.h.b16 %v62_v12  ;;  %v588_v30 = vld [vmem:[#allocation7 + $0x70] sm:$0xff]  ;;  %v579_v33 = vld [vmem:[#allocation7 + $0x28] sm:$0xff] }
  0x16   :  { %v587_v34 = vld [vmem:[#allocation7 + $0x68] sm:$0xff]  ;;  %v578_v35 = vld [vmem:[#allocation7 + $0x20] sm:$0xff]  ;;  %v577_v37 = vld [vmem:[#allocation7 + $0x18] sm:$0xff] }
  0x17   :  { %231 = vmatpush.bf16.msra.mxu0 %v563_v4  ;;  %264 = vmatpush.bf16.msra.mxu2 %v563_v4  ;;  %v65_v19 = vsub.f32 %v60_v10, %v63_v15  ;;  %v66_v20 = vsub.f32 %v61_v11, %v64_v16  ;;  %v258_v31 = vpack.c.b16 %v256_v25, %v256_v25  ;;  %v586_v36 = vld [vmem:[#allocation7 + $0x60] sm:$0xff]  ;;  %v585_v38 = vld [vmem:[#allocation7 + $0x58] sm:$0xff]  ;;  %v576_v39 = vld [vmem:[#allocation7 + $0x10] sm:$0xff] }
  0x18   :  { %244 = vmatpush.bf16.msra.mxu1 %v571_v5  ;;  %277 = vmatpush.bf16.msra.mxu3 %v571_v5  ;;  %v259_v32 = vpack.c.b16 %v257_v26, %v257_v26  ;;  %v584_v40 = vld [vmem:[#allocation7 + $0x50] sm:$0xff]  ;;  %v575_v41 = vld [vmem:[#allocation7 + $0x8] sm:$0xff]  ;;  %v574_v43 = vld [vmem:[#allocation7] sm:$0xff] }
  0x19   :  { %v67_v27 = vpack.c.bf16 %v65_v19, %v65_v19  ;;  %v68_v28 = vpack.c.bf16 %v66_v20, %v66_v20  ;;  %v583_v42 = vld [vmem:[#allocation7 + $0x48] sm:$0xff]  ;;  %v582_v44 = vld [vmem:[#allocation7 + $0x40] sm:$0xff] }
  0x1b   :  { %232 = vmatpush.bf16.msra.mxu0 %v562_v6  ;;  %265 = vmatpush.bf16.msra.mxu2 %v562_v6 }
  0x1c   :  { %245 = vmatpush.bf16.msra.mxu1 %v570_v7  ;;  %278 = vmatpush.bf16.msra.mxu3 %v570_v7 }
  0x1f   :  { %233 = vmatpush.bf16.msra.mxu0 %v561_v8  ;;  %266 = vmatpush.bf16.msra.mxu2 %v561_v8 }
  0x20   :  { %246 = vmatpush.bf16.msra.mxu1 %v569_v9  ;;  %279 = vmatpush.bf16.msra.mxu3 %v569_v9 }
  0x23   :  { %234 = vmatpush.bf16.msra.mxu0 %v560_v13  ;;  %267 = vmatpush.bf16.msra.mxu2 %v560_v13 }
  0x24   :  { %247 = vmatpush.bf16.msra.mxu1 %v568_v14  ;;  %280 = vmatpush.bf16.msra.mxu3 %v568_v14 }
  0x27   :  { %235 = vmatpush.bf16.msra.mxu0 %v559_v17  ;;  %268 = vmatpush.bf16.msra.mxu2 %v559_v17 }
  0x28   :  { %248 = vmatpush.bf16.msra.mxu1 %v567_v18  ;;  %281 = vmatpush.bf16.msra.mxu3 %v567_v18 }
  0x2b   :  { %236 = vmatpush.bf16.msra.mxu0 %v558_v21  ;;  %269 = vmatpush.bf16.msra.mxu2 %v558_v21 }
  0x2c   :  { %249 = vmatpush.bf16.msra.mxu1 %v566_v22  ;;  %282 = vmatpush.bf16.msra.mxu3 %v566_v22 }
  0x2e   :  { %237 = vmatmul.bf16.vlgmr.msra.gmra.mxu0 %v67_v27  ;;  %270 = vmatmul.bf16.vlgmr.msra.gmra.mxu2 %v258_v31 }
  0x2f   :  { %384 = vmatpush.bf16.msrb.mxu0 %v581_v23  ;;  %250 = vmatmul.bf16.vlgmr.msra.gmra.mxu1 %v68_v28 }
  0x30   :  { %397 = vmatpush.bf16.msrb.mxu1 %v589_v24  ;;  %283 = vmatmul.bf16.vlgmr.msra.gmra.mxu3 %v259_v32 }
  0x33   :  { %385 = vmatpush.bf16.msrb.mxu0 %v580_v29 }
  0x34   :  { %398 = vmatpush.bf16.msrb.mxu1 %v588_v30 }
  0x37   :  { %386 = vmatpush.bf16.msrb.mxu0 %v579_v33 }
  0x38   :  { %399 = vmatpush.bf16.msrb.mxu1 %v587_v34 }
  0x3b   :  { %387 = vmatpush.bf16.msrb.mxu0 %v578_v35 }
  0x3c   :  { %400 = vmatpush.bf16.msrb.mxu1 %v586_v36 }
  0x3f   :  { %388 = vmatpush.bf16.msrb.mxu0 %v577_v37 }
  0x40   :  { %401 = vmatpush.bf16.msrb.mxu1 %v585_v38 }
  0x43   :  { %389 = vmatpush.bf16.msrb.mxu0 %v576_v39 }
  0x44   :  { %402 = vmatpush.bf16.msrb.mxu1 %v584_v40 }
  0x47   :  { %390 = vmatpush.bf16.msrb.mxu0 %v575_v41 }
  0x48   :  { %403 = vmatpush.bf16.msrb.mxu1 %v583_v42 }
  0x4b   :  { %391 = vmatpush.bf16.msrb.mxu0 %v574_v43 }
  0x4c   :  { %404 = vmatpush.bf16.msrb.mxu1 %v582_v44 }
  0x4e   :  { %392 = vmatmul.bf16.vlgmr.msrb.gmra.mxu0 %v258_v31 }
  0x4f   :  { %405 = vmatmul.bf16.vlgmr.msrb.gmra.mxu1 %v259_v32 }
  0xab   :  { %v238_v45 = vpop.f32.mrf.mxu0 }
  0xac   :  { %v251_v46 = vpop.f32.mrf.mxu1 }
  0xad   :  { %v252_v53 = vadd.f32 %v251_v46, %v238_v45 }
  0xb1   :  { %v271_v49 = vpop.f32.mrf.mxu2 }
  0xb2   :  { %v272_v54 = vadd.f32 %v271_v49, %v252_v53 }
  0xb3   :  { %v240_v47 = vpop.f32.mrf.mxu0  ;;  %v284_v50 = vpop.f32.mrf.mxu3 }
  0xb4   :  { %v253_v48 = vpop.f32.mrf.mxu1  ;;  %v285_v57 = vadd.f32 %v284_v50, %v272_v54 }
  0xb9   :  { %v273_v51 = vpop.f32.mrf.mxu2 }
  0xbb   :  { %v286_v52 = vpop.f32.mrf.mxu3 }
  0xcb   :  { %v393_v55 = vpop.f32.mrf.mxu0 }
  0xcc   :  { %v406_v56 = vpop.f32.mrf.mxu1 }
  0xcd   :  { %v407_v58 = vadd.f32 %v406_v56, %v393_v55 }
  0xcf   :  { %v410_v59 = vadd.f32 %v407_v58, %v285_v57 }
  0xd1   :  { %411 = vst [vmem:[#allocation8] sm:$0xff] %v410_v59 }
  0xd2   :  { %422 = dma.vmem_to_hbm [thread:$0]  %s418_s2, 128, %s420_s30, [#allocation4]  }
  0xd3   :  { %v395_v60 = vpop.f32.mrf.mxu0 }
  0xd4   :  { %v408_v61 = vpop.f32.mrf.mxu1 }
  0xd5   :  { %696 = dma.done.wait [#allocation4], 128  }
  0xd6   :  { %697 = vsyncadd [#allocation4], 4294967168 }
  0xd7   :  { %427 = vsyncpa [#allocation3], 1 }
  0xd8   :  { %428 = vsyncpa [#allocation6], 1 }
  0xd9   :  { %429 = vsyncpa [#allocation4], 1 }

</bundles_post_ra>
